<compile_context>
chip_gen: v7x
topology: tpu7x:2x2x1
jax: 0.10.0
libtpu: 0.0.40
codegen_flags: <defaults>
</compile_context>

<pallas_src>
import numpy as np
import jax
import jax.numpy as jnp
from jax import lax
from jax.experimental import pallas as pl
from jax.experimental.pallas import tpu as pltpu


_TARGET_BLOCK_BYTES = 8 * 1024 * 1024   # ~8 MiB per output block (x2 pipeline bufs)


def _hash_u32(x):
    # "lowbias32" integer finalizer: strong avalanche, every bit ~ Bernoulli(0.5).
    x = x ^ (x >> 16)
    x = x * jnp.uint32(0x7FEB352D)
    x = x ^ (x >> 15)
    x = x * jnp.uint32(0x846CA68B)
    x = x ^ (x >> 16)
    return x


def _binary_source_kernel(seed_ref, out_ref):
    """Fill one (block_groups, rows_per_group, lanes) block with random {0,1}."""
    block_groups, rows_per_group, lanes = out_ref.shape
    blk = pl.program_id(0).astype(jnp.uint32)
    seed_u = seed_ref[0].astype(jnp.uint32)

    # Per-block stream seed (scalar-unit work, free): folding the block id in
    # means the element counter only needs to be block-local, so the stream
    # never repeats even for > 2^32 total elements.
    block_stream = _hash_u32(_hash_u32(seed_u ^ jnp.uint32(0x9E3779B9)) ^ blk)

    # One hash word per (group, lane) column; harvest rows_per_group bits from
    # each word across the sublanes of its group.  This amortizes the two u32
    # multiplies and the index math ~rows_per_group x per element.
    grp_ids = lax.broadcasted_iota(
        jnp.int32, (block_groups, 1, lanes), 0).astype(jnp.uint32)
    col_ids = lax.broadcasted_iota(
        jnp.int32, (block_groups, 1, lanes), 2).astype(jnp.uint32)
    idx = grp_ids * jnp.uint32(lanes) + col_ids            # block-local counter
    h = _hash_u32(idx ^ block_stream)                      # (G, 1, lanes)

    sub_ids = lax.broadcasted_iota(
        jnp.int32, (block_groups, rows_per_group, lanes), 1).astype(jnp.uint32)
    bits = (h >> sub_ids) & jnp.uint32(1)                  # broadcast over sublanes
    out_ref[...] = bits.astype(out_ref.dtype)


def _rows_per_group(dtype):
    # Dtype-aware sublane-group height: 8 (f32), 16 (bf16), 32 (i8/fp8).
    itemsize = jnp.dtype(dtype).itemsize
    return max(8, 32 // max(itemsize, 1))


def binary_source(shape, seed=12345, dtype=jnp.float32):
    """Generate a deterministic random-binary tensor of `shape` on TPU."""
    shape = tuple(int(s) for s in shape)
    total = int(np.prod(shape)) if len(shape) > 0 else 1
    if total == 0:
        return jnp.zeros(shape, dtype=dtype)

    itemsize = jnp.dtype(dtype).itemsize
    rows = _rows_per_group(dtype)

    # Widest lane count whose group tiles the request exactly (unmasked stores,
    # no wrapper slice); otherwise fall back to 128 lanes to minimize padding.
    lanes = 128
    for cand in (1024, 512, 256, 128):
        if total % (cand * rows) == 0:
            lanes = cand
            break

    group_elems = rows * lanes
    group_bytes = group_elems * itemsize
    n_groups = pl.cdiv(total, group_elems)
    padded_total = n_groups * group_elems

    # ~8 MiB blocks; partial last block is masked by Pallas (no extra padding
    # block written to HBM).
    block_groups = max(1, min(_TARGET_BLOCK_BYTES // group_bytes, n_groups))
    grid = (pl.cdiv(n_groups, block_groups),)
    block_bytes = block_groups * group_bytes
    vmem_limit = min(max(2 * block_bytes + (4 << 20), 16 << 20), 32 << 20)

    seed_arr = jnp.asarray(
        np.array([int(seed) & 0xFFFFFFFF], dtype=np.uint32).view(np.int32))

    slab = pl.pallas_call(
        _binary_source_kernel,
        out_shape=jax.ShapeDtypeStruct((n_groups, rows, lanes), dtype),
        grid_spec=pltpu.PrefetchScalarGridSpec(
            num_scalar_prefetch=1,
            grid=grid,
            in_specs=[],
            out_specs=pl.BlockSpec((block_groups, rows, lanes),
                                   lambda i, seed_ref: (i, 0, 0)),
        ),
        compiler_params=pltpu.CompilerParams(
            dimension_semantics=("parallel",),   # shard blocks across TCs (v7x)
            vmem_limit_bytes=vmem_limit,
        ),
        cost_estimate=pl.CostEstimate(
            flops=6 * padded_total,
            transcendentals=0,
            bytes_accessed=padded_total * itemsize,
        ),
    )(seed_arr)

    if padded_total == total:
        return slab.reshape(shape)                      # free metadata reshape
    return slab.reshape(-1)[:total].reshape(shape)      # ragged sizes only


if __name__ == "__main__":
    # Deterministic example "input": a requested output shape, as the torch
    # module would receive (list or 1-D tensor of dims).
    key = jax.random.PRNGKey(0)  # unused for bits — the module uses a fixed seed
    requested_shape = [2, 4, 16, 16]

    out = jax.block_until_ready(
        binary_source(requested_shape, seed=12345, dtype=jnp.float32))

    assert out.shape == tuple(requested_shape), out.shape
    assert out.dtype == jnp.float32, out.dtype
    vals = np.asarray(out)
    assert np.all((vals == 0.0) | (vals == 1.0)), "non-binary values produced"
    assert 0.35 < float(vals.mean()) < 0.65, "bits are not ~Bernoulli(0.5)"

    # Determinism: same seed -> same bits.
    out2 = jax.block_until_ready(binary_source(requested_shape, seed=12345))
    assert np.array_equal(vals, np.asarray(out2)), "non-deterministic output"

    # Different seed -> different stream.
    out3 = jax.block_until_ready(binary_source(requested_shape, seed=777))
    assert not np.array_equal(vals, np.asarray(out3)), "seed ignored"

    print("KERNEL_OK")
</pallas_src>

<mosaic_0001>
module attributes {stable_mosaic.version = 11 : i64} {
  func.func @_binary_source_kernel(%arg0: i32, %arg1: memref<1xi32, #tpu.memory_space<smem>>, %arg2: memref<1x8x256xf32, #tpu.memory_space<vmem>>) attributes {dimension_semantics = [#tpu.dimension_semantics<parallel>], iteration_bounds = array<i64: 1>, scalar_prefetch = 1 : i64, scratch_operands = 0 : i64, tpu.core_type = #tpu.core_type<tc>, window_params = [{transform_indices = @transform_0, window_bounds = array<i64: 1, 8, 256>}]} {
    %c0 = arith.constant 0 : index
    %0 = memref.load %arg1[%c0] : memref<1xi32, #tpu.memory_space<smem>>
    %c-1640531527_i32 = arith.constant -1640531527 : i32
    %1 = arith.xori %0, %c-1640531527_i32 : i32
    %c16_i32 = arith.constant 16 : i32
    %2 = arith.shrui %1, %c16_i32 : i32
    %3 = arith.xori %1, %2 : i32
    %c2146121005_i32 = arith.constant 2146121005 : i32
    %4 = arith.muli %3, %c2146121005_i32 : i32
    %c15_i32 = arith.constant 15 : i32
    %5 = arith.shrui %4, %c15_i32 : i32
    %6 = arith.xori %4, %5 : i32
    %c-2073254261_i32 = arith.constant -2073254261 : i32
    %7 = arith.muli %6, %c-2073254261_i32 : i32
    %c16_i32_0 = arith.constant 16 : i32
    %8 = arith.shrui %7, %c16_i32_0 : i32
    %9 = arith.xori %7, %8 : i32
    %10 = arith.xori %9, %arg0 : i32
    %c16_i32_1 = arith.constant 16 : i32
    %11 = arith.shrui %10, %c16_i32_1 : i32
    %12 = arith.xori %10, %11 : i32
    %c2146121005_i32_2 = arith.constant 2146121005 : i32
    %13 = arith.muli %12, %c2146121005_i32_2 : i32
    %c15_i32_3 = arith.constant 15 : i32
    %14 = arith.shrui %13, %c15_i32_3 : i32
    %15 = arith.xori %13, %14 : i32
    %c-2073254261_i32_4 = arith.constant -2073254261 : i32
    %16 = arith.muli %15, %c-2073254261_i32_4 : i32
    %c16_i32_5 = arith.constant 16 : i32
    %17 = arith.shrui %16, %c16_i32_5 : i32
    %18 = arith.xori %16, %17 : i32
    %19 = tpu.iota {dimensions = array<i32: 0>} : vector<1x1x256xi32>
    %20 = tpu.iota {dimensions = array<i32: 2>} : vector<1x1x256xi32>
    %c256_i32 = arith.constant 256 : i32
    %21 = vector.broadcast %c256_i32 : i32 to vector<1x1x256xi32>
    %22 = arith.muli %19, %21 : vector<1x1x256xi32>
    %23 = arith.addi %22, %20 : vector<1x1x256xi32>
    %24 = vector.broadcast %18 : i32 to vector<1x1x256xi32>
    %25 = arith.xori %23, %24 : vector<1x1x256xi32>
    %c16_i32_6 = arith.constant 16 : i32
    %26 = vector.broadcast %c16_i32_6 : i32 to vector<1x1x256xi32>
    %27 = arith.shrui %25, %26 : vector<1x1x256xi32>
    %28 = arith.xori %25, %27 : vector<1x1x256xi32>
    %c2146121005_i32_7 = arith.constant 2146121005 : i32
    %29 = vector.broadcast %c2146121005_i32_7 : i32 to vector<1x1x256xi32>
    %30 = arith.muli %28, %29 : vector<1x1x256xi32>
    %c15_i32_8 = arith.constant 15 : i32
    %31 = vector.broadcast %c15_i32_8 : i32 to vector<1x1x256xi32>
    %32 = arith.shrui %30, %31 : vector<1x1x256xi32>
    %33 = arith.xori %30, %32 : vector<1x1x256xi32>
    %c-2073254261_i32_9 = arith.constant -2073254261 : i32
    %34 = vector.broadcast %c-2073254261_i32_9 : i32 to vector<1x1x256xi32>
    %35 = arith.muli %33, %34 : vector<1x1x256xi32>
    %c16_i32_10 = arith.constant 16 : i32
    %36 = vector.broadcast %c16_i32_10 : i32 to vector<1x1x256xi32>
    %37 = arith.shrui %35, %36 : vector<1x1x256xi32>
    %38 = arith.xori %35, %37 : vector<1x1x256xi32>
    %39 = tpu.iota {dimensions = array<i32: 1>} : vector<1x8x256xi32>
    %40 = vector.broadcast %38 : vector<1x1x256xi32> to vector<1x8x256xi32>
    %41 = arith.shrui %40, %39 : vector<1x8x256xi32>
    %c1_i32 = arith.constant 1 : i32
    %42 = vector.broadcast %c1_i32 : i32 to vector<1x8x256xi32>
    %43 = arith.andi %41, %42 : vector<1x8x256xi32>
    %44 = arith.uitofp %43 : vector<1x8x256xi32> to vector<1x8x256xf32>
    %c0_11 = arith.constant 0 : index
    %c0_12 = arith.constant 0 : index
    %c0_13 = arith.constant 0 : index
    %45 = vector.load %arg2[%c0_11, %c0_12, %c0_13] : memref<1x8x256xf32, #tpu.memory_space<vmem>>, vector<1x8x256xf32>
    tpu.vector_store %arg2[%c0_11, %c0_12, %c0_13], %44 {strides = array<i32>} : memref<1x8x256xf32, #tpu.memory_space<vmem>>, vector<1x8x256xf32>,
    return
  }
  func.func @transform_0(%arg0: i32, %arg1: memref<1xi32, #tpu.memory_space<smem>>) -> (i32, i32, i32) {
    %c0_i32 = arith.constant 0 : i32
    %c0_i32_0 = arith.constant 0 : i32
    %c0_i32_1 = arith.constant 0 : i32
    return %arg0, %c0_i32, %c0_i32_0 : i32, i32, i32
  }
}

</mosaic_0001>

<bundles_post_ra>
// kernel: tpu_custom_call.1
= control target key start
LH: loop header
LB: loop body
LE: loop exit
PB: predicated region body
PF: predicated region fallthrough
CT: control target
= control target key end

     0   :  { %s134_s0 = inlined_call_operand.<no memory space> [shape: s32[1], index: 0, kind: input, shape index: {}]   ;;  %s135_s1 = inlined_call_operand.hbm [shape: f32[1,8,256], index: 1, kind: output, shape index: {}]  }
   0x1   :  { %s9_s8 = sxor.u32 2654435769, %s134_s0 }
   0x2   :  { %7 = vsyncpa [#allocation5], 0  ;;  %s10_s9 = sshrl.u32 %s9_s8, 16  ;;  %v27_v0 = vlaneseq  ;;  %s108_s24 = smov [#allocation4]  }
   0x3   :  { %s11_s10 = sxor.u32 %s10_s9, %s9_s8  ;;  %s75_s25 = sshll.u32 %s108_s24, 4  ;;  %s76_s25 = int_to_ptr.vmem [resolvable:$true] %s75_s25 }
   0x4   :  { %s12_s11 = smul.u32 2146121005, %s11_s10  ;;  %v28_v1 = vand.u32 127, %v27_v0  ;;  %v50_v19 = vshrl.u32 %v27_v0, 7  ;;  %s84_s26 = scalar_lea.vmem %s76_s25, 256 }
   0x5   :  { %p85_p0 = scmp.ne.s32.totalorder %s76_s25, %s84_s26  ;;  %p89_p1 = scmp.lt.s32.totalorder %s76_s25, %s76_s25 }
   0x6   :  { %s13_s12 = sshrl.u32 %s12_s11, 15  ;;  %v29_v2 = vadd.s32 128, %v28_v1  ;;  %p90_p2 = scmp.lt.s32.totalorder %s84_s26, %s84_s26 }
   0x7   :  { %s14_s13 = sxor.u32 %s13_s12, %s12_s11 }
   0x8   :  { %s15_s14 = smul.u32 2221713035, %s14_s13  ;;  %p91_p3 = por %p90_p2, %p89_p1 }
   0xa   :  { %s16_s15 = sshrl.u32 %s15_s14, 16  ;;  %p92_p4 = pnand %p91_p3, %p85_p0 }
   0xb   :  { %s17_s16 = sxor.u32 %s16_s15, %s15_s14 }
   0xc   :  { %s19_s17 = sshrl.u32 %s17_s16, 16 }
   0xd   :  { %s20_s18 = sxor.u32 %s19_s17, %s17_s16 }
   0xe   :  { %s21_s19 = smul.u32 2146121005, %s20_s18 }
  0x10   :  { %s22_s20 = sshrl.u32 %s21_s19, 15 }
  0x11   :  { %s23_s21 = sxor.u32 %s22_s20, %s21_s19 }
  0x12   :  { %s24_s22 = smul.u32 2221713035, %s23_s21 }
  0x14   :  { %s25_s23 = sshrl.u32 %s24_s22, 16 }
  0x15   :  { %s26_s0 = sxor.u32 %s25_s23, %s24_s22 }
  0x16   :  { %v30_v3 = vstv %s26_s0 }
  0x17   :  { %v31_v4 = vxor.u32 %v30_v3, %v28_v1  ;;  %v32_v5 = vxor.u32 %v30_v3, %v29_v2 }
  0x19   :  { %v33_v6 = vshrl.u32 %v31_v4, 16  ;;  %v34_v7 = vshrl.u32 %v32_v5, 16 }
  0x1b   :  { %v35_v8 = vxor.u32 %v33_v6, %v31_v4  ;;  %v36_v9 = vxor.u32 %v34_v7, %v32_v5 }
  0x1d   :  { %v37_v10 = vmul.u32 2146121005, %v35_v8  ;;  %v38_v11 = vmul.u32 2146121005, %v36_v9 }
  0x1f   :  { %v39_v12 = vshrl.u32 %v37_v10, 15  ;;  %v40_v13 = vshrl.u32 %v38_v11, 15 }
  0x21   :  { %v41_v14 = vxor.u32 %v39_v12, %v37_v10  ;;  %v42_v15 = vxor.u32 %v40_v13, %v38_v11 }
  0x23   :  { %v43_v16 = vmul.u32 2221713035, %v41_v14  ;;  %v44_v17 = vmul.u32 2221713035, %v42_v15 }
  0x25   :  { %v45_v18 = vshrl.u32 %v43_v16, 16  ;;  %v46_v20 = vshrl.u32 %v44_v17, 16 }
  0x27   :  { %v47_v21 = vxor.u32 %v45_v18, %v43_v16  ;;  %v48_v22 = vxor.u32 %v46_v20, %v44_v17 }
  0x29   :  { %v51_v23 = vshrl.u32 %v47_v21, %v50_v19  ;;  %v52_v24 = vshrl.u32 %v48_v22, %v50_v19 }
  0x2b   :  { %v53_v25 = vand.u32 1, %v51_v23  ;;  %v54_v26 = vand.u32 1, %v52_v24 }
  0x2d   :  { %v55_v27 = vshrl.u32 %v53_v25, 16  ;;  %v56_v28 = vand.u32 65535, %v53_v25  ;;  %v61_v29 = vshrl.u32 %v54_v26, 16  ;;  %v62_v30 = vand.u32 65535, %v54_v26 }
  0x2f   :  { %v57_v31 = vcvt.s32.f32 %v55_v27  ;;  %v59_v32 = vcvt.s32.f32 %v56_v28  ;;  %v63_v33 = vcvt.s32.f32 %v61_v29  ;;  %v65_v34 = vcvt.s32.f32 %v62_v30 }
  0x31   :  { %v58_v35 = vmul.f32 65536.0, %v57_v31  ;;  %v64_v36 = vmul.f32 65536.0, %v63_v33 }
  0x33   :  { %v60_v37 = vadd.f32 %v59_v32, %v58_v35  ;;  %v66_v38 = vadd.f32 %v65_v34, %v64_v36 }
  0x35   :  { %67 = vst [vmem:[#allocation4] sm:$0xff] %v60_v37  ;;  %68 = vst [vmem:[#allocation4 + $0x8] sm:$0xff] %v66_v38 }
  0x36   :  { %95 = shalt.err (!%p92_p4)
}
  0x37   :  { %s96_s29 = scalar_lea.hbm %s135_s1, 256 }
  0x38   :  { %p97_p5 = scmp.ne.s32.totalorder %s135_s1, %s96_s29  ;;  %p100_p6 = scmp.lt.u32.totalorder %s96_s29, %s135_s1 }
  0x3a   :  { %p102_p7 = pnand %p100_p6, %p97_p5 }
  0x3c   :  { %105 = shalt.err (!%p102_p7)
}
  0x3d   :  { %78 = dma.vmem_to_hbm [thread:$0]  %s76_s25, 256, %s135_s1, [#allocation5]  }
  0x3e   :  { %106 = dma.done.wait [#allocation5], 256  }
  0x3f   :  { %107 = vsyncadd [#allocation5], 4294967040 }
  0x40   :  { %82 = vsyncpa [#allocation5], 1 }

</bundles_post_ra>
